<compile_context>
chip_gen: v7x
topology: tpu7x:2x2x1
jax: 0.10.0
libtpu: 0.0.40
codegen_flags: <defaults>
</compile_context>

<pallas_src>
import functools

import jax
import jax.numpy as jnp
from jax.experimental import pallas as pl
from jax.experimental.pallas import tpu as pltpu

LN_EPS = 1e-5


def _ln_mixer(new_res, w_ref, b_ref, hs_out_ref, res_out_ref):
    # LayerNorm statistics in f32 (two-pass centered variance for stability;
    # `centered` is reused for the variance so only two XLU reductions/tile).
    mean = jnp.mean(new_res, axis=-1, keepdims=True)
    centered = new_res - mean
    var = jnp.mean(centered * centered, axis=-1, keepdims=True)
    x = centered * jax.lax.rsqrt(var + LN_EPS)
    # gamma/beta are pre-folded into (w, b) on the host; cast the LN output to
    # bf16 so the MXU runs at native bf16 rate, accumulate in f32.
    y = jnp.dot(x.astype(jnp.bfloat16), w_ref[...],
                preferred_element_type=jnp.float32) + b_ref[...]
    hs_out_ref[...] = y.astype(hs_out_ref.dtype)
    res_out_ref[...] = new_res                     # residual_in_fp32=True


def _block_kernel_with_res(hs_ref, res_ref, w_ref, b_ref,
                           hs_out_ref, res_out_ref):
    new_res = res_ref[...].astype(jnp.float32) + hs_ref[...].astype(jnp.float32)
    _ln_mixer(new_res, w_ref, b_ref, hs_out_ref, res_out_ref)


def _block_kernel_no_res(hs_ref, w_ref, b_ref, hs_out_ref, res_out_ref):
    # residual is None: residual := hidden_states, no add, no zeros streamed.
    new_res = hs_ref[...].astype(jnp.float32)
    _ln_mixer(new_res, w_ref, b_ref, hs_out_ref, res_out_ref)


def _round_up(x, m):
    return ((x + m - 1) // m) * m


@functools.partial(jax.jit, static_argnames=("row_tile",))
def block_forward(hidden_states, residual, gamma, beta, w_mixer, b_mixer,
                  row_tile=256):
    B, L, D = hidden_states.shape
    N = B * L
    has_res = residual is not None

    hs_bytes = jnp.dtype(hidden_states.dtype).itemsize
    res_bytes = jnp.dtype(residual.dtype).itemsize if has_res else 0

    # ---- tile-size / VMEM budgeting (all static Python arithmetic) --------
    rt = max(8, min(row_tile, _round_up(N, 8)))
    rt = (rt // 8) * 8

    def vmem_est(r):
        # double-buffered hs in/out, res in (if any), f32 res out, + weights.
        tot = 2 * r * D * (2 * hs_bytes + res_bytes + 4)
        tot += 2 * (D * D * 2 + D * 4)             # bf16 weight + f32 bias
        return tot

    VMEM_BUDGET = 44 * 1024 * 1024                 # headroom on v7x's 64 MiB VMEM
    while rt > 8 and vmem_est(rt) > VMEM_BUDGET:
        rt = max(8, ((rt // 2) // 8) * 8)
    # TODO(synk): for very large D (>= ~4096) the resident (D, D) bf16 weight
    #             alone exceeds the budget; tile the weight over the
    #             output-column axis (grid=(rows, D//tn)) in that regime.

    N_pad = _round_up(N, rt)
    grid = (N_pad // rt,)

    # ---- host-side param folding: LN affine into the mixer ----------------
    gamma_f = gamma.astype(jnp.float32)
    beta_f = beta.astype(jnp.float32)
    w_f = w_mixer.astype(jnp.float32)
    w_folded = (gamma_f[:, None] * w_f).astype(jnp.bfloat16)   # diag(gamma) @ W
    b_folded = (beta_f @ w_f + b_mixer.astype(jnp.float32)).reshape(1, D)

    hs2d = hidden_states.reshape(N, D)
    if N_pad != N:
        hs2d = jnp.pad(hs2d, ((0, N_pad - N), (0, 0)))

    row_spec = pl.BlockSpec((rt, D), lambda i: (i, 0))
    w_spec = pl.BlockSpec((D, D), lambda i: (0, 0))
    vec_spec = pl.BlockSpec((1, D), lambda i: (0, 0))

    bytes_accessed = (N_pad * D * (2 * hs_bytes + res_bytes + 4)
                      + D * D * 2 + D * 4)
    cost = pl.CostEstimate(flops=2 * N_pad * D * D + 10 * N_pad * D,
                           transcendentals=N_pad,
                           bytes_accessed=bytes_accessed)

    out_shape = (jax.ShapeDtypeStruct((N_pad, D), hidden_states.dtype),
                 jax.ShapeDtypeStruct((N_pad, D), jnp.float32))
    out_specs = (row_spec, row_spec)
    compiler_params = pltpu.CompilerParams(
        dimension_semantics=("parallel",),
        vmem_limit_bytes=min(max(int(vmem_est(rt) * 2), 32 * 1024 * 1024),
                             56 * 1024 * 1024),
    )

    if has_res:
        res2d = residual.reshape(N, D)
        if N_pad != N:
            res2d = jnp.pad(res2d, ((0, N_pad - N), (0, 0)))
        hs_out, res_out = pl.pallas_call(
            _block_kernel_with_res,
            out_shape=out_shape,
            grid_spec=pltpu.PrefetchScalarGridSpec(
                num_scalar_prefetch=0,
                grid=grid,
                in_specs=[row_spec, row_spec, w_spec, vec_spec],
                out_specs=out_specs),
            compiler_params=compiler_params,
            cost_estimate=cost,
        )(hs2d, res2d, w_folded, b_folded)
    else:
        hs_out, res_out = pl.pallas_call(
            _block_kernel_no_res,
            out_shape=out_shape,
            grid_spec=pltpu.PrefetchScalarGridSpec(
                num_scalar_prefetch=0,
                grid=grid,
                in_specs=[row_spec, w_spec, vec_spec],
                out_specs=out_specs),
            compiler_params=compiler_params,
            cost_estimate=cost,
        )(hs2d, w_folded, b_folded)

    hs_out = hs_out[:N].reshape(B, L, D)
    res_out = res_out[:N].reshape(B, L, D)
    return hs_out, res_out


def _reference(hidden_states, residual, gamma, beta, w_mixer, b_mixer):
    hs = hidden_states.astype(jnp.float32)
    res = hs if residual is None else residual.astype(jnp.float32) + hs
    mean = jnp.mean(res, axis=-1, keepdims=True)
    var = jnp.mean((res - mean) ** 2, axis=-1, keepdims=True)
    x = (res - mean) / jnp.sqrt(var + LN_EPS) * gamma + beta
    y = x @ w_mixer + b_mixer
    return y.astype(hidden_states.dtype), res.astype(jnp.float32)


if __name__ == "__main__":
    B, L, D = 2, 8, 128
    key = jax.random.PRNGKey(0)
    k_hs, k_res, k_w, k_g, k_b = jax.random.split(key, 5)

    hidden_states = jax.random.normal(k_hs, (B, L, D), dtype=jnp.float32)
    residual_in = jax.random.normal(k_res, (B, L, D), dtype=jnp.float32)

    # Non-trivial LN affine to exercise the host-side folding.
    gamma = 1.0 + 0.1 * jax.random.normal(k_g, (D,), dtype=jnp.float32)
    beta = 0.05 * jax.random.normal(k_b, (D,), dtype=jnp.float32)
    w_mixer = jax.random.normal(k_w, (D, D), dtype=jnp.float32) * (1.0 / D ** 0.5)
    b_mixer = jnp.zeros((D,), dtype=jnp.float32)

    # Case 1: residual provided.
    hs_out, res_out = block_forward(hidden_states, residual_in, gamma, beta,
                                    w_mixer, b_mixer)
    jax.block_until_ready((hs_out, res_out))
    hs_ref, res_ref = _reference(hidden_states, residual_in, gamma, beta,
                                 w_mixer, b_mixer)
    # hs goes through a bf16 MXU matmul -> looser tolerance; residual is exact f32.
    assert jnp.allclose(hs_out, hs_ref, atol=5e-2, rtol=5e-2)
    assert jnp.allclose(res_out, res_ref, atol=1e-6, rtol=1e-6)

    # Case 2: residual is None (first block).
    hs_out0, res_out0 = block_forward(hidden_states, None, gamma, beta,
                                      w_mixer, b_mixer)
    jax.block_until_ready((hs_out0, res_out0))
    hs_ref0, res_ref0 = _reference(hidden_states, None, gamma, beta,
                                   w_mixer, b_mixer)
    assert jnp.allclose(hs_out0, hs_ref0, atol=5e-2, rtol=5e-2)
    assert jnp.allclose(res_out0, res_ref0, atol=1e-6, rtol=1e-6)

    print("KERNEL_OK")
</pallas_src>

<mosaic_0001>
module attributes {stable_mosaic.version = 11 : i64} {
  func.func @_block_kernel_with_res(%arg0: i32, %arg1: memref<16x128xf32, #tpu.memory_space<vmem>>, %arg2: memref<16x128xf32, #tpu.memory_space<vmem>>, %arg3: memref<128x128xbf16, #tpu.memory_space<vmem>>, %arg4: memref<1x128xf32, #tpu.memory_space<vmem>>, %arg5: memref<16x128xf32, #tpu.memory_space<vmem>>, %arg6: memref<16x128xf32, #tpu.memory_space<vmem>>) attributes {dimension_semantics = [#tpu.dimension_semantics<parallel>], iteration_bounds = array<i64: 1>, scalar_prefetch = 0 : i64, scratch_operands = 0 : i64, tpu.core_type = #tpu.core_type<tc>, window_params = [{transform_indices = @transform_0, window_bounds = array<i64: 16, 128>}, {transform_indices = @transform_1, window_bounds = array<i64: 16, 128>}, {pipeline_mode = #tpu.pipeline_mode<synchronous>, transform_indices = @transform_2, window_bounds = array<i64: 128, 128>}, {pipeline_mode = #tpu.pipeline_mode<synchronous>, transform_indices = @transform_3, window_bounds = array<i64: 1, 128>}, {transform_indices = @transform_4, window_bounds = array<i64: 16, 128>}, {transform_indices = @transform_5, window_bounds = array<i64: 16, 128>}]} {
    %c0 = arith.constant 0 : index
    %c0_0 = arith.constant 0 : index
    %0 = vector.load %arg2[%c0, %c0_0] : memref<16x128xf32, #tpu.memory_space<vmem>>, vector<16x128xf32>
    %c0_1 = arith.constant 0 : index
    %c0_2 = arith.constant 0 : index
    %1 = vector.load %arg1[%c0_1, %c0_2] : memref<16x128xf32, #tpu.memory_space<vmem>>, vector<16x128xf32>
    %2 = arith.addf %0, %1 : vector<16x128xf32>
    %cst = arith.constant dense<0.000000e+00> : vector<16xf32>
    %3 = vector.multi_reduction <add>, %2, %cst [1] : vector<16x128xf32> to vector<16xf32>
    %4 = vector.shape_cast %3 : vector<16xf32> to vector<16x1xf32>
    %cst_3 = arith.constant 1.280000e+02 : f32
    %5 = vector.broadcast %cst_3 : f32 to vector<16x1xf32>
    %6 = arith.divf %4, %5 : vector<16x1xf32>
    %7 = vector.broadcast %6 : vector<16x1xf32> to vector<16x128xf32>
    %8 = arith.subf %2, %7 : vector<16x128xf32>
    %9 = arith.mulf %8, %8 : vector<16x128xf32>
    %cst_4 = arith.constant dense<0.000000e+00> : vector<16xf32>
    %10 = vector.multi_reduction <add>, %9, %cst_4 [1] : vector<16x128xf32> to vector<16xf32>
    %11 = vector.shape_cast %10 : vector<16xf32> to vector<16x1xf32>
    %cst_5 = arith.constant 1.280000e+02 : f32
    %12 = vector.broadcast %cst_5 : f32 to vector<16x1xf32>
    %13 = arith.divf %11, %12 : vector<16x1xf32>
    %cst_6 = arith.constant 9.99999974E-6 : f32
    %14 = vector.broadcast %cst_6 : f32 to vector<16x1xf32>
    %15 = arith.addf %13, %14 : vector<16x1xf32>
    %16 = math.rsqrt %15 : vector<16x1xf32>
    %17 = vector.broadcast %16 : vector<16x1xf32> to vector<16x128xf32>
    %18 = arith.mulf %8, %17 : vector<16x128xf32>
    %19 = arith.truncf %18 : vector<16x128xf32> to vector<16x128xbf16>
    %c0_7 = arith.constant 0 : index
    %c0_8 = arith.constant 0 : index
    %20 = vector.load %arg3[%c0_7, %c0_8] : memref<128x128xbf16, #tpu.memory_space<vmem>>, vector<128x128xbf16>
    %cst_9 = arith.constant dense<0.000000e+00> : vector<16x128xf32>
    %21 = tpu.matmul %19, %20, %cst_9 {dimension_numbers = #tpu.dot_dimension_numbers<[1], [0], [0], [1], [0, 0, 1, 1], [], []>} : vector<16x128xbf16>, vector<128x128xbf16>, vector<16x128xf32> -> vector<16x128xf32>
    %c0_10 = arith.constant 0 : index
    %c0_11 = arith.constant 0 : index
    %22 = vector.load %arg4[%c0_10, %c0_11] : memref<1x128xf32, #tpu.memory_space<vmem>>, vector<1x128xf32>
    %23 = vector.broadcast %22 : vector<1x128xf32> to vector<16x128xf32>
    %24 = arith.addf %21, %23 : vector<16x128xf32>
    %c0_12 = arith.constant 0 : index
    %c0_13 = arith.constant 0 : index
    %25 = vector.load %arg5[%c0_12, %c0_13] : memref<16x128xf32, #tpu.memory_space<vmem>>, vector<16x128xf32>
    tpu.vector_store %arg5[%c0_12, %c0_13], %24 {strides = array<i32>} : memref<16x128xf32, #tpu.memory_space<vmem>>, vector<16x128xf32>,
    %c0_14 = arith.constant 0 : index
    %c0_15 = arith.constant 0 : index
    %26 = vector.load %arg6[%c0_14, %c0_15] : memref<16x128xf32, #tpu.memory_space<vmem>>, vector<16x128xf32>
    tpu.vector_store %arg6[%c0_14, %c0_15], %2 {strides = array<i32>} : memref<16x128xf32, #tpu.memory_space<vmem>>, vector<16x128xf32>,
    return
  }
  func.func @transform_0(%arg0: i32) -> (i32, i32) {
    %c0_i32 = arith.constant 0 : i32
    %c0_i32_0 = arith.constant 0 : i32
    return %arg0, %c0_i32 : i32, i32
  }
  func.func @transform_1(%arg0: i32) -> (i32, i32) {
    %c0_i32 = arith.constant 0 : i32
    %c0_i32_0 = arith.constant 0 : i32
    return %arg0, %c0_i32 : i32, i32
  }
  func.func @transform_2(%arg0: i32) -> (i32, i32) {
    %c0_i32 = arith.constant 0 : i32
    %c0_i32_0 = arith.constant 0 : i32
    %c0_i32_1 = arith.constant 0 : i32
    return %c0_i32, %c0_i32_0 : i32, i32
  }
  func.func @transform_3(%arg0: i32) -> (i32, i32) {
    %c0_i32 = arith.constant 0 : i32
    %c0_i32_0 = arith.constant 0 : i32
    %c0_i32_1 = arith.constant 0 : i32
    return %c0_i32, %c0_i32_0 : i32, i32
  }
  func.func @transform_4(%arg0: i32) -> (i32, i32) {
    %c0_i32 = arith.constant 0 : i32
    %c0_i32_0 = arith.constant 0 : i32
    return %arg0, %c0_i32 : i32, i32
  }
  func.func @transform_5(%arg0: i32) -> (i32, i32) {
    %c0_i32 = arith.constant 0 : i32
    %c0_i32_0 = arith.constant 0 : i32
    return %arg0, %c0_i32 : i32, i32
  }
}

</mosaic_0001>

<bundles_post_ra>
// kernel: block_forward.1
= control target key start
LH: loop header
LB: loop body
LE: loop exit
PB: predicated region body
PF: predicated region fallthrough
CT: control target
= control target key end

     0   :  { %11 = vsyncpa [#allocation3], 0  ;;  %s409_s0 = inlined_call_operand.vmem [shape: f32[16,128], index: 0, kind: input, shape index: {}]   ;;  %s410_s1 = inlined_call_operand.vmem [shape: f32[16,128], index: 1, kind: input, shape index: {}]   ;;  %s411_s2 = inlined_call_operand.vmem [shape: bf16[128,128], index: 2, kind: input, shape index: {}]   ;;  %s412_s3 = inlined_call_operand.vmem [shape: f32[1,128], index: 3, kind: input, shape index: {}]   ;;  %s413_s4 = inlined_call_operand.hbm [shape: f32[16,128], index: 4, kind: output, shape index: {0}]   ;;  %s414_s5 = inlined_call_operand.hbm [shape: f32[16,128], index: 5, kind: output, shape index: {1}]  }
   0x1   :  { %v22_v0 = vld [vmem:[%s410_s1] sm:$0xff]  ;;  %v23_v2 = vld [vmem:[%s410_s1 + $0x8] sm:$0xff] }
   0x2   :  { %v24_v1 = vld [vmem:[%s409_s0] sm:$0xff]  ;;  %v25_v4 = vld [vmem:[%s409_s0 + $0x8] sm:$0xff] }
   0x3   :  { %v26_v3 = vadd.f32 %v24_v1, %v22_v0  ;;  %v27_v5 = vadd.f32 %v25_v4, %v23_v2 }
   0x5   :  { %28 = vadd.xlane.f32.xlu0 %v26_v3  ;;  %166 = vst [vmem:[#allocation4] sm:$0xff] %v26_v3  ;;  %167 = vst [vmem:[#allocation4 + $0x8] sm:$0xff] %v27_v5 }
   0x6   :  { %12 = vsyncpa [#allocation5], 0  ;;  %v244_v6 = vld [vmem:[%s411_s2] sm:$0xff]   ;;  %v304_v7 = vmov 0.0   ;;  %v245_v8 = vld [vmem:[%s411_s2 + $0x8] sm:$0xff]   ;;  %vm305_vm0 = vmmov 0  }
   0x7   :  { %218 = vmatprep.subr.bf16.mxu0 %v304_v7  ;;  %v246_v17 = vld [vmem:[%s411_s2 + $0x10] sm:$0xff]   ;;  %v247_v18 = vld [vmem:[%s411_s2 + $0x18] sm:$0xff]   ;;  %v248_v19 = vld [vmem:[%s411_s2 + $0x20] sm:$0xff]   ;;  %234 = vmatprep.mubr.msk.bf16.mxu0 %vm305_vm0, %v304_v7  ;;  %s306_s15 = smov [#allocation4]  }
   0x8   :  { %219 = vmatpush3.bf16.msra.mxu0 %v244_v6  ;;  %v249_v20 = vld [vmem:[%s411_s2 + $0x28] sm:$0xff]   ;;  %v250_v21 = vld [vmem:[%s411_s2 + $0x30] sm:$0xff]   ;;  %v251_v22 = vld [vmem:[%s411_s2 + $0x38] sm:$0xff]   ;;  %s185_s16 = sshll.u32 %s306_s15, 4  ;;  %s186_s16 = int_to_ptr.vmem [resolvable:$true] %s185_s16 }
   0x9   :  { %30 = vadd.xlane.f32.xlu0 %v27_v5  ;;  %220 = vmatprep.subr.bf16.mxu0 %v304_v7  ;;  %s256_s2 = scalar_lea.vmem %s186_s16, 256  ;;  %p261_p1 = scmp.lt.s32.totalorder %s186_s16, %s186_s16 }
   0xa   :  { %p257_p0 = scmp.ne.s32.totalorder %s186_s16, %s256_s2  ;;  %p262_p2 = scmp.lt.s32.totalorder %s256_s2, %s256_s2 }
   0xc   :  { %221 = vmatpush3.bf16.msra.mxu0 %v245_v8  ;;  %p263_p3 = por %p262_p2, %p261_p1 }
   0xd   :  { %222 = vmatprep.subr.bf16.mxu0 %v304_v7 }
   0xe   :  { %p264_p4 = pnand %p263_p3, %p257_p0 }
  0x10   :  { %223 = vmatpush3.bf16.msra.mxu0 %v246_v17 }
  0x11   :  { %224 = vmatprep.subr.bf16.mxu0 %v304_v7 }
  0x14   :  { %225 = vmatpush3.bf16.msra.mxu0 %v247_v18 }
  0x15   :  { %226 = vmatprep.subr.bf16.mxu0 %v304_v7 }
  0x18   :  { %227 = vmatpush3.bf16.msra.mxu0 %v248_v19 }
  0x19   :  { %228 = vmatprep.subr.bf16.mxu0 %v304_v7 }
  0x1c   :  { %229 = vmatpush3.bf16.msra.mxu0 %v249_v20 }
  0x1d   :  { %230 = vmatprep.subr.bf16.mxu0 %v304_v7 }
  0x20   :  { %231 = vmatpush3.bf16.msra.mxu0 %v250_v21 }
  0x21   :  { %232 = vmatprep.subr.bf16.mxu0 %v304_v7 }
  0x24   :  { %233 = vmatpush3.bf16.msra.mxu0 %v251_v22 }
  0x92   :  { %v29_v9 = vpop.xlane.xlu0 %28 }
  0x93   :  { %v33_v10 = vmul.f32 0.0078125, %v29_v9 }
  0x95   :  { %v35_v11 = vsub.f32 %v26_v3, %v33_v10 }
  0x96   :  { %v31_v12 = vpop.xlane.xlu0 %30 }
  0x97   :  { %v34_v13 = vmul.f32 0.0078125, %v31_v12  ;;  %v37_v14 = vmul.f32 %v35_v11, %v35_v11 }
  0x99   :  { %v36_v15 = vsub.f32 %v27_v5, %v34_v13  ;;  %39 = vadd.xlane.f32.xlu1 %v37_v14 }
  0x9b   :  { %v38_v16 = vmul.f32 %v36_v15, %v36_v15 }
  0x9d   :  { %41 = vadd.xlane.f32.xlu1 %v38_v16 }
 0x126   :  { %v40_v23 = vpop.xlane.xlu1 %39 }
 0x127   :  { %v43_v24 = vmul.f32 0.0078125, %v40_v23 }
 0x129   :  { %v45_v25 = vadd.f32 1e-05, %v43_v24 }
 0x12a   :  { %v42_v26 = vpop.xlane.xlu1 %41 }
 0x12b   :  { %v44_v27 = vmul.f32 0.0078125, %v42_v26  ;;  %252 = vrsqrt.f32 %v45_v25 }
 0x12d   :  { %v46_v28 = vadd.f32 1e-05, %v44_v27 }
 0x12f   :  { %254 = vrsqrt.f32 %v46_v28 }
 0x135   :  { %v253_v29 = vpop.eup %252 }
 0x136   :  { %v49_v31 = vmul.f32 %v253_v29, %v35_v11 }
 0x139   :  { %v255_v30 = vpop.eup %254 }
 0x13a   :  { %v50_v32 = vmul.f32 %v255_v30, %v36_v15 }
 0x13c   :  { %v51_v33 = vpack.c.bf16 %v50_v32, %v49_v31 }
 0x13e   :  { %235 = vmatmul.mubr.bf16.vlgmr.msra.gmra.mrb[0].mxu0 %v51_v33 }
 0x13f   :  { %267 = shalt.err (!%p264_p4)
}
 0x140   :  { %s268_s19 = scalar_lea.hbm %s414_s5, 256 }
 0x141   :  { %p269_p5 = scmp.ne.s32.totalorder %s414_s5, %s268_s19  ;;  %p272_p6 = scmp.lt.u32.totalorder %s268_s19, %s414_s5 }
 0x143   :  { %p274_p7 = pnand %p272_p6, %p269_p5 }
 0x145   :  { %277 = shalt.err (!%p274_p7)
}
 0x146   :  { %s307_s24 = smov 128   ;;  %s308_s25 = smov 8   ;;  %v200_v34 = vld [vmem:[%s412_s3] ss:$0 sm:$0xff] }
 0x147   :  { %191 = dma.vmem_to_hbm [thread:$0]  %s186_s16, 256, %s414_s5, [#allocation5], %s307_s24, %s307_s24, %s308_s25  }
 0x148   :  { %s309_s0 = smov [#allocation2]  }
 0x149   :  { %s173_s29 = sshll.u32 %s309_s0, 4  ;;  %s174_s29 = int_to_ptr.vmem [resolvable:$true] %s173_s29 }
 0x14a   :  { %s278_s30 = scalar_lea.vmem %s174_s29, 256  ;;  %p283_p9 = scmp.lt.s32.totalorder %s174_s29, %s174_s29 }
 0x14b   :  { %p279_p8 = scmp.ne.s32.totalorder %s174_s29, %s278_s30  ;;  %p284_p10 = scmp.lt.s32.totalorder %s278_s30, %s278_s30 }
 0x14d   :  { %p285_p11 = por %p284_p10, %p283_p9 }
 0x14f   :  { %p286_p12 = pnand %p285_p11, %p279_p8 }
 0x211   :  { %v157_v35 = vpop.f32.mrb[0].mxu0 }
 0x212   :  { %v158_v36 = vadd.f32 %v200_v34, %v157_v35  ;;  %v236_v37 = vpop.f32.mrb[1].mxu0 }
 0x213   :  { %v160_v38 = vpop.f32.mrb[2].mxu0 }
 0x214   :  { %164 = vst [vmem:[#allocation2] sm:$0xff] %v158_v36  ;;  %v161_v39 = vadd.f32 %v200_v34, %v160_v38  ;;  %v237_v40 = vpop.f32.mrb[3].mxu0 }
 0x216   :  { %165 = vst [vmem:[#allocation2 + $0x8] sm:$0xff] %v161_v39 }
 0x217   :  { %289 = shalt.err (!%p286_p12)
}
 0x218   :  { %s290_s6 = scalar_lea.hbm %s413_s4, 256 }
 0x219   :  { %p291_p13 = scmp.ne.s32.totalorder %s413_s4, %s290_s6  ;;  %p294_p0 = scmp.lt.u32.totalorder %s290_s6, %s413_s4 }
 0x21b   :  { %p296_p1 = pnand %p294_p0, %p291_p13 }
 0x21d   :  { %299 = shalt.err (!%p296_p1)
}
 0x21e   :  { %179 = dma.vmem_to_hbm [thread:$0]  %s174_s29, 256, %s413_s4, [#allocation3], %s307_s24, %s307_s24, %s308_s25  }
 0x21f   :  { %300 = dma.done.wait [#allocation3], 256  }
 0x220   :  { %301 = vsyncadd [#allocation3], 4294967040 }
 0x221   :  { %302 = dma.done.wait [#allocation5], 256  }
 0x222   :  { %303 = vsyncadd [#allocation5], 4294967040 }
 0x223   :  { %198 = vsyncpa [#allocation3], 1 }
 0x224   :  { %199 = vsyncpa [#allocation5], 1 }

</bundles_post_ra>
